<compile_context>
chip_gen: v7x
topology: tpu7x:2x2x1
jax: 0.10.0
libtpu: 0.0.40
codegen_flags: <defaults>
</compile_context>

<pallas_src>
import functools

import jax
import jax.numpy as jnp
from jax.experimental import pallas as pl
from jax.experimental.pallas import tpu as pltpu


def _round_up(x: int, m: int) -> int:
    return ((x + m - 1) // m) * m


def residual_add_kernel(x_ref, w_ref, b_ref, o_ref, *, resident_w: bool):
    # x_ref: [tm, Hp] f32   w_ref: [Hp, tn] bf16   b_ref: [1, tn] f32
    # o_ref: [tm, tn]
    x = x_ref[...]                                         # f32 row tile
    # bf16 operands feed the MXU at native rate; accumulate in f32.
    acc = jnp.dot(x.astype(jnp.bfloat16), w_ref[...],
                  preferred_element_type=jnp.float32)      # [tm, tn] f32

    if resident_w:
        # Single column tile covering all of H: residual is x itself (exact f32).
        res = x
    else:
        # Column-streamed W: residual is the 128-aligned column slice of x
        # matching this output tile.
        tn = o_ref.shape[-1]
        col0 = pl.multiple_of(pl.program_id(1) * tn, 128)
        res = x_ref[:, pl.ds(col0, tn)]

    # Bias + residual epilogue in f32; one lane-dense store per tile.
    o_ref[...] = (acc + b_ref[...] + res).astype(o_ref.dtype)


def _plan_tiles(M: int, H_pad: int, vmem_cap: int, out_bytes: int):
    """Pick (tm, tn, resident_w) so the VMEM working set fits this chip."""
    budget = vmem_cap - (6 << 20)            # headroom for Mosaic internal scratch
    tm_target = 256 if vmem_cap <= (64 << 20) else 512   # v7x vs v5e/v6e
    tm = min(tm_target, _round_up(M, 8))

    def resident_bytes(tm_):
        # W + bias single-buffered (Buffered(1)); x / out row tiles double-buffered.
        return (H_pad * H_pad * 2 + H_pad * 4
                + 2 * tm_ * H_pad * 4 + 2 * tm_ * H_pad * out_bytes)

    def streamed_bytes(tm_, tn_):
        # W / bias / out column-streamed (double-buffered); x row tile reused
        # across the inner N axis but still double-buffered along M.
        return (2 * H_pad * tn_ * 2 + 2 * tn_ * 4
                + 2 * tm_ * H_pad * 4 + 2 * tm_ * tn_ * out_bytes)

    while True:
        if resident_bytes(tm) <= budget:
            return tm, H_pad, True
        # Column-stream W: largest lane-aligned tn that divides H_pad and fits.
        for tn in range(H_pad - 128, 127, -128):
            if H_pad % tn == 0 and streamed_bytes(tm, tn) <= budget:
                return tm, tn, False
        if tm <= 8:
            return tm, 128, False            # last resort (unrealistically huge H)
        tm = max(8, tm // 2)


@functools.partial(jax.jit, static_argnames=("out_dtype",))
def residual_add(x, w, b, *, out_dtype=None):
    """out = x @ w + b + x, fused in a single Pallas kernel.

    x: [B, S, H] float32
    w: [H, H]   (already transposed so that fn(x) = x @ w + b)
    b: [H]
    out_dtype: optional narrower output dtype (e.g. bfloat16) to halve the
               HBM write stream; defaults to x.dtype.
    """
    B, S, H = x.shape
    M = B * S
    out_dtype = x.dtype if out_dtype is None else out_dtype
    out_bytes = jnp.dtype(out_dtype).itemsize

    # Lane-dense hidden dim.  Pad only when H is not already a multiple of 128
    # (padded K columns must be zero for matmul correctness).  No padding along M.
    H_pad = _round_up(H, 128)
    x2 = x.reshape(M, H)
    if H_pad != H:
        x2 = jnp.pad(x2, ((0, 0), (0, H_pad - H)))
        w = jnp.pad(w, ((0, H_pad - H), (0, H_pad - H)))
        b = jnp.pad(b, (0, H_pad - H))

    w_bf16 = w.astype(jnp.bfloat16)              # halves W HBM traffic / VMEM
    b2 = b.reshape(1, H_pad).astype(jnp.float32)

    # Per-chip VMEM capacity (v5e/v6e: 128 MiB, v7x: 64 MiB per TC).
    try:
        vmem_cap = int(pltpu.get_tpu_info().vmem_capacity_bytes)
    except Exception:
        vmem_cap = 64 << 20                      # conservative fallback

    tm, tn, resident_w = _plan_tiles(M, H_pad, vmem_cap, out_bytes)
    grid = (pl.cdiv(M, tm), H_pad // tn)         # ragged last row block is fine

    # x row tile: streamed along i, reused (not re-DMA'd) across the inner j axis.
    x_spec = pl.BlockSpec((tm, H_pad), lambda i, j: (i, 0))
    if resident_w:
        # Constant index_map -> fetched once; Buffered(1) avoids reserving a
        # second W-sized VMEM buffer (the biggest VMEM lever).
        w_spec = pl.BlockSpec((H_pad, tn), lambda i, j: (0, 0),
                              pipeline_mode=pl.Buffered(1))
        b_spec = pl.BlockSpec((1, tn), lambda i, j: (0, 0),
                              pipeline_mode=pl.Buffered(1))
    else:
        # Column-streamed W/bias: double-buffered along the inner j axis.
        w_spec = pl.BlockSpec((H_pad, tn), lambda i, j: (0, j))
        b_spec = pl.BlockSpec((1, tn), lambda i, j: (0, j))
    out_spec = pl.BlockSpec((tm, tn), lambda i, j: (i, j))

    # VMEM actually needed by the chosen plan (+ slack), kept below physical cap.
    if resident_w:
        plan_bytes = (H_pad * H_pad * 2 + H_pad * 4
                      + 2 * tm * H_pad * 4 + 2 * tm * tn * out_bytes)
    else:
        plan_bytes = (2 * H_pad * tn * 2 + 2 * tn * 4
                      + 2 * tm * H_pad * 4 + 2 * tm * tn * out_bytes)
    vmem_limit = int(max(min(int(plan_bytes * 1.25) + (2 << 20),
                             vmem_cap - (2 << 20)),
                         16 << 20))

    cost = pl.CostEstimate(
        flops=2 * M * H_pad * H_pad,
        transcendentals=0,
        bytes_accessed=(M * H_pad * 4 + w_bf16.size * 2 + b2.size * 4
                        + M * H_pad * out_bytes),
    )

    out2 = pl.pallas_call(
        functools.partial(residual_add_kernel, resident_w=resident_w),
        out_shape=jax.ShapeDtypeStruct((M, H_pad), out_dtype),
        grid_spec=pltpu.PrefetchScalarGridSpec(
            num_scalar_prefetch=0,
            grid=grid,
            in_specs=[x_spec, w_spec, b_spec],
            out_specs=out_spec,
        ),
        compiler_params=pltpu.CompilerParams(
            # All (i, j) output tiles are independent -> shard across TCs on v7x.
            dimension_semantics=("parallel", "parallel"),
            vmem_limit_bytes=vmem_limit,
        ),
        cost_estimate=cost,
    )(x2, w_bf16, b2)

    if H_pad != H:
        out2 = out2[:, :H]
    return out2.reshape(B, S, H)


if __name__ == "__main__":
    # Small, lane-dense shapes: batch=2, seq=8, hidden=128 (multiple of 128).
    B, S, H = 2, 8, 128
    key = jax.random.PRNGKey(0)
    kx, kw, kb = jax.random.split(key, 3)

    x = jax.random.normal(kx, (B, S, H), dtype=jnp.float32)
    # Deterministic Linear(hidden, hidden) params; PyTorch stores W as [out, in],
    # we pass W.T so the kernel computes x @ W^T + b.
    w_pt = jax.random.normal(kw, (H, H), dtype=jnp.float32) * 0.02
    b_pt = jax.random.normal(kb, (H,), dtype=jnp.float32) * 0.02
    w = w_pt.T

    out = residual_add(x, w, b_pt)
    jax.block_until_ready(out)

    # Reference: ResidualAdd(Linear).forward in pure JAX f32.  Tolerance is
    # loosened because the matmul operands are rounded to bf16 inside the
    # kernel (accumulation and the bias/residual add remain f32) — an
    # intentional precision/speed tradeoff.
    ref = x @ w + b_pt + x
    assert jnp.allclose(out, ref, atol=2e-2, rtol=2e-2), "mismatch vs reference"

    print("KERNEL_OK")
</pallas_src>

<mosaic_0001>
module attributes {stable_mosaic.version = 11 : i64} {
  func.func @residual_add_kernel(%arg0: i32, %arg1: i32, %arg2: memref<16x128xf32, #tpu.memory_space<vmem>>, %arg3: memref<128x128xbf16, #tpu.memory_space<vmem>>, %arg4: memref<1x128xf32, #tpu.memory_space<vmem>>, %arg5: memref<16x128xf32, #tpu.memory_space<vmem>>) attributes {dimension_semantics = [#tpu.dimension_semantics<parallel>, #tpu.dimension_semantics<parallel>], iteration_bounds = array<i64: 1, 1>, scalar_prefetch = 0 : i64, scratch_operands = 0 : i64, tpu.core_type = #tpu.core_type<tc>, window_params = [{transform_indices = @transform_0, window_bounds = array<i64: 16, 128>}, {pipeline_mode = #tpu.pipeline_mode<synchronous>, transform_indices = @transform_1, window_bounds = array<i64: 128, 128>}, {pipeline_mode = #tpu.pipeline_mode<synchronous>, transform_indices = @transform_2, window_bounds = array<i64: 1, 128>}, {transform_indices = @transform_3, window_bounds = array<i64: 16, 128>}]} {
    %c0 = arith.constant 0 : index
    %c0_0 = arith.constant 0 : index
    %0 = vector.load %arg2[%c0, %c0_0] : memref<16x128xf32, #tpu.memory_space<vmem>>, vector<16x128xf32>
    %1 = arith.truncf %0 : vector<16x128xf32> to vector<16x128xbf16>
    %c0_1 = arith.constant 0 : index
    %c0_2 = arith.constant 0 : index
    %2 = vector.load %arg3[%c0_1, %c0_2] : memref<128x128xbf16, #tpu.memory_space<vmem>>, vector<128x128xbf16>
    %cst = arith.constant dense<0.000000e+00> : vector<16x128xf32>
    %3 = tpu.matmul %1, %2, %cst {dimension_numbers = #tpu.dot_dimension_numbers<[1], [0], [0], [1], [0, 0, 1, 1], [], []>} : vector<16x128xbf16>, vector<128x128xbf16>, vector<16x128xf32> -> vector<16x128xf32>
    %c0_3 = arith.constant 0 : index
    %c0_4 = arith.constant 0 : index
    %4 = vector.load %arg4[%c0_3, %c0_4] : memref<1x128xf32, #tpu.memory_space<vmem>>, vector<1x128xf32>
    %5 = vector.broadcast %4 : vector<1x128xf32> to vector<16x128xf32>
    %6 = arith.addf %3, %5 : vector<16x128xf32>
    %7 = arith.addf %6, %0 : vector<16x128xf32>
    %c0_5 = arith.constant 0 : index
    %c0_6 = arith.constant 0 : index
    %8 = vector.load %arg5[%c0_5, %c0_6] : memref<16x128xf32, #tpu.memory_space<vmem>>, vector<16x128xf32>
    tpu.vector_store %arg5[%c0_5, %c0_6], %7 {strides = array<i32>} : memref<16x128xf32, #tpu.memory_space<vmem>>, vector<16x128xf32>,
    return
  }
  func.func @transform_0(%arg0: i32, %arg1: i32) -> (i32, i32) {
    %c0_i32 = arith.constant 0 : i32
    %c0_i32_0 = arith.constant 0 : i32
    return %arg0, %c0_i32 : i32, i32
  }
  func.func @transform_1(%arg0: i32, %arg1: i32) -> (i32, i32) {
    %c0_i32 = arith.constant 0 : i32
    %c0_i32_0 = arith.constant 0 : i32
    %c0_i32_1 = arith.constant 0 : i32
    return %c0_i32, %c0_i32_0 : i32, i32
  }
  func.func @transform_2(%arg0: i32, %arg1: i32) -> (i32, i32) {
    %c0_i32 = arith.constant 0 : i32
    %c0_i32_0 = arith.constant 0 : i32
    %c0_i32_1 = arith.constant 0 : i32
    return %c0_i32, %c0_i32_0 : i32, i32
  }
  func.func @transform_3(%arg0: i32, %arg1: i32) -> (i32, i32) {
    %c0_i32 = arith.constant 0 : i32
    return %arg0, %arg1 : i32, i32
  }
}

</mosaic_0001>

<bundles_post_ra>
// kernel: residual_add.1
= control target key start
LH: loop header
LB: loop body
LE: loop exit
PB: predicated region body
PF: predicated region fallthrough
CT: control target
= control target key end

     0   :  { %v226_v1 = vmov 0.0   ;;  %vm227_vm0 = vmmov 0   ;;  %s296_s0 = inlined_call_operand.vmem [shape: f32[16,128], index: 0, kind: input, shape index: {}]   ;;  %s297_s1 = inlined_call_operand.vmem [shape: bf16[128,128], index: 1, kind: input, shape index: {}]   ;;  %s298_s2 = inlined_call_operand.vmem [shape: f32[1,128], index: 2, kind: input, shape index: {}]   ;;  %s299_s3 = inlined_call_operand.hbm [shape: f32[16,128], index: 3, kind: output, shape index: {}]  }
   0x1   :  { %v194_v0 = vld [vmem:[%s297_s1] sm:$0xff]   ;;  %169 = vmatprep.subr.bf16.mxu0 %v226_v1  ;;  %v195_v2 = vld [vmem:[%s297_s1 + $0x8] sm:$0xff]   ;;  %185 = vmatprep.mubr.msk.bf16.mxu0 %vm227_vm0, %v226_v1  ;;  %v196_v3 = vld [vmem:[%s297_s1 + $0x10] sm:$0xff]  }
   0x2   :  { %170 = vmatpush3.bf16.msra.mxu0 %v194_v0 }
   0x3   :  { %171 = vmatprep.subr.bf16.mxu0 %v226_v1 }
   0x6   :  { %172 = vmatpush3.bf16.msra.mxu0 %v195_v2 }
   0x7   :  { %173 = vmatprep.subr.bf16.mxu0 %v226_v1 }
   0x8   :  { %8 = vsyncpa [#allocation3], 0  ;;  %v197_v4 = vld [vmem:[%s297_s1 + $0x18] sm:$0xff]   ;;  %v198_v5 = vld [vmem:[%s297_s1 + $0x20] sm:$0xff]  }
   0x9   :  { %v199_v6 = vld [vmem:[%s297_s1 + $0x28] sm:$0xff]   ;;  %v200_v7 = vld [vmem:[%s297_s1 + $0x30] sm:$0xff]   ;;  %v201_v8 = vld [vmem:[%s297_s1 + $0x38] sm:$0xff]   ;;  %s228_s1 = smov [#allocation2]  }
   0xa   :  { %174 = vmatpush3.bf16.msra.mxu0 %v196_v3  ;;  %v16_v9 = vld [vmem:[%s296_s0] sm:$0xff]  ;;  %v17_v10 = vld [vmem:[%s296_s0 + $0x8] sm:$0xff]  ;;  %s140_s7 = sshll.u32 %s228_s1, 4  ;;  %s141_s7 = int_to_ptr.vmem [resolvable:$true] %s140_s7 }
   0xb   :  { %175 = vmatprep.subr.bf16.mxu0 %v226_v1  ;;  %v18_v11 = vpack.c.bf16 %v17_v10, %v16_v9  ;;  %v151_v12 = vld [vmem:[%s298_s2] ss:$0 sm:$0xff]  ;;  %s202_s0 = scalar_lea.vmem %s141_s7, 256  ;;  %p207_p1 = scmp.lt.s32.totalorder %s141_s7, %s141_s7 }
   0xc   :  { %p203_p0 = scmp.ne.s32.totalorder %s141_s7, %s202_s0  ;;  %p208_p2 = scmp.lt.s32.totalorder %s202_s0, %s202_s0 }
   0xe   :  { %176 = vmatpush3.bf16.msra.mxu0 %v197_v4  ;;  %p209_p3 = por %p208_p2, %p207_p1 }
   0xf   :  { %177 = vmatprep.subr.bf16.mxu0 %v226_v1 }
  0x10   :  { %p210_p4 = pnand %p209_p3, %p203_p0 }
  0x12   :  { %178 = vmatpush3.bf16.msra.mxu0 %v198_v5 }
  0x13   :  { %179 = vmatprep.subr.bf16.mxu0 %v226_v1 }
  0x16   :  { %180 = vmatpush3.bf16.msra.mxu0 %v199_v6 }
  0x17   :  { %181 = vmatprep.subr.bf16.mxu0 %v226_v1 }
  0x1a   :  { %182 = vmatpush3.bf16.msra.mxu0 %v200_v7 }
  0x1b   :  { %183 = vmatprep.subr.bf16.mxu0 %v226_v1 }
  0x1e   :  { %184 = vmatpush3.bf16.msra.mxu0 %v201_v8 }
  0x21   :  { %186 = vmatmul.mubr.bf16.vlgmr.msra.gmra.mrb[0].mxu0 %v18_v11 }
  0xf4   :  { %v124_v13 = vpop.f32.mrb[0].mxu0 }
  0xf5   :  { %v125_v14 = vadd.f32 %v151_v12, %v124_v13  ;;  %v187_v15 = vpop.f32.mrb[1].mxu0 }
  0xf6   :  { %v127_v16 = vpop.f32.mrb[2].mxu0 }
  0xf7   :  { %v131_v17 = vadd.f32 %v125_v14, %v16_v9  ;;  %v128_v18 = vadd.f32 %v151_v12, %v127_v16  ;;  %v188_v19 = vpop.f32.mrb[3].mxu0 }
  0xf9   :  { %133 = vst [vmem:[#allocation2] sm:$0xff] %v131_v17  ;;  %v132_v20 = vadd.f32 %v128_v18, %v17_v10 }
  0xfb   :  { %134 = vst [vmem:[#allocation2 + $0x8] sm:$0xff] %v132_v20 }
  0xfc   :  { %213 = shalt.err (!%p210_p4)
}
  0xfd   :  { %s214_s9 = scalar_lea.hbm %s299_s3, 256 }
  0xfe   :  { %p215_p5 = scmp.ne.s32.totalorder %s299_s3, %s214_s9  ;;  %p218_p6 = scmp.lt.u32.totalorder %s214_s9, %s299_s3 }
 0x100   :  { %p220_p7 = pnand %p218_p6, %p215_p5 }
 0x102   :  { %223 = shalt.err (!%p220_p7)
}
 0x103   :  { %s229_s14 = smov 128   ;;  %s230_s15 = smov 8  }
 0x104   :  { %146 = dma.vmem_to_hbm [thread:$0]  %s141_s7, 256, %s299_s3, [#allocation3], %s229_s14, %s229_s14, %s230_s15  }
 0x105   :  { %224 = dma.done.wait [#allocation3], 256  }
 0x106   :  { %225 = vsyncadd [#allocation3], 4294967040 }
 0x107   :  { %150 = vsyncpa [#allocation3], 1 }

</bundles_post_ra>
